<compile_context>
chip_gen: v7x
topology: tpu7x:2x2x1
jax: 0.10.0
libtpu: 0.0.40
codegen_flags: <defaults>
</compile_context>

<pallas_src>
import jax
import jax.numpy as jnp
import numpy as np
from jax.experimental import pallas as pl
from jax.experimental.pallas import tpu as pltpu

EPS = 1e-5
N, C_IN, H, W = 2, 6, 4, 5          # batch, in-channels, spatial
C1, C2 = 3, 6                       # conv1 / conv2 output channels
KH = KW = 2                         # conv + pool kernel size
HO, WO = H + 1, W + 1               # conv output spatial (pad=1, k=2, stride=1) -> (5, 6)
PH, PW = HO - 1, WO - 1             # maxpool(2, stride=1) output spatial -> (4, 5)
LANE = 128                          # lane-block stride for stacked selection matrices
W1_COLS = C_IN * KH * KW            # 24
W2_COLS = KH * KW * C1              # 12


def _sel_slab(n):
    """Constant 0/1 selection slab (f32).

    rows [0, L)      : pool-select matrices P_k stacked in 128-lane blocks.
                       Column 128*k + p is one-hot at the conv-layout position read
                       by pool tap k at pooled position p (p = b*PH*PW + i*PW + j).
    rows [g_off, +P) : conv2 tap-gather matrices G_k stacked likewise.
                       Column 128*k + q is one-hot at the pooled position read
                       (zero for padding) by conv tap k at conv-output position q.
    """
    L, P = n * HO * WO, n * PH * PW
    g_off = ((L + 7) // 8) * 8
    rows = ((g_off + P + 7) // 8) * 8
    slab = np.zeros((rows, KH * KW * LANE), np.float32)
    for b in range(n):
        for i in range(PH):
            for j in range(PW):
                p = b * PH * PW + i * PW + j
                for di in range(KH):
                    for dj in range(KW):
                        q = b * HO * WO + (i + di) * WO + (j + dj)
                        slab[q, (di * KW + dj) * LANE + p] = 1.0
    for b in range(n):
        for io in range(HO):
            for jo in range(WO):
                q = b * HO * WO + io * WO + jo
                for di in range(KH):
                    for dj in range(KW):
                        i, j = io + di - 1, jo + dj - 1
                        if 0 <= i < PH and 0 <= j < PW:
                            p = b * PH * PW + i * PW + j
                            slab[g_off + p, (di * KW + dj) * LANE + q] = 1.0
    return slab, g_off


def _make_kernel(n, g_off):
    L, P = n * HO * WO, n * PH * PW

    def kernel(a1_ref, sel_ref, w_ref, o_ref):
        # ---- unpack the packed inputs (static sub-tile views, no (8,128) crossings)
        pool_mat = sel_ref[pl.ds(0, L), :]                       # (L, 4*128)
        gat_mat = sel_ref[pl.ds(g_off, P), :]                    # (P, 4*128)
        w1 = w_ref[pl.ds(0, C1), pl.ds(0, W1_COLS)]              # (3, 24)
        g1 = w_ref[pl.ds(0, C1), pl.ds(W1_COLS, 1)]              # (3, 1)
        be1 = w_ref[pl.ds(0, C1), pl.ds(W1_COLS + 1, 1)]
        w2 = w_ref[pl.ds(8, C2), pl.ds(0, W2_COLS)]              # (6, 12)
        g2 = w_ref[pl.ds(8, C2), pl.ds(W2_COLS, 1)]              # (6, 1)
        be2 = w_ref[pl.ds(8, C2), pl.ds(W2_COLS + 1, 1)]
        wf = w_ref[pl.ds(16, C2), :]                             # (6, 128): folded fc weights, 0 past lane P
        bf = w_ref[pl.ds(24, 1), pl.ds(0, 1)]                    # (1, 1):   folded fc bias

        def bn_relu(c, g, be):
            inv = 1.0 / float(c.shape[1])                        # count of THIS tile
            mean = jnp.sum(c, axis=1, keepdims=True) * inv
            var = jnp.sum(c * c, axis=1, keepdims=True) * inv - mean * mean
            var = jnp.maximum(var, 0.0)                          # guard E[x^2]-m^2 rounding
            y = (c - mean) * (g * jax.lax.rsqrt(var + EPS)) + be
            return jnp.maximum(y, 0.0)

        def maxpool(y):
            # one matmul against the lane-block-stacked select matrix,
            # then three vreg-aligned maxes; lanes >= P of the result are exactly 0.
            r = jnp.dot(y, pool_mat, preferred_element_type=jnp.float32)     # (C, 512)
            return jnp.maximum(jnp.maximum(r[:, 0:LANE], r[:, LANE:2 * LANE]),
                               jnp.maximum(r[:, 2 * LANE:3 * LANE], r[:, 3 * LANE:4 * LANE]))

        # ---- layer 1: conv (1 matmul on host-built im2col) + BN + ReLU + pool
        c1 = jnp.dot(w1, a1_ref[...], preferred_element_type=jnp.float32)    # (3, L)
        p1 = maxpool(bn_relu(c1, g1, be1))                                   # (3, 128)

        # ---- layer 2: ONE stacked gather matmul builds all 4 conv taps in lane
        # blocks; conv2 is distributed over the taps (no sublane concat).
        taps = jnp.dot(p1[:, 0:P], gat_mat, preferred_element_type=jnp.float32)  # (3, 512)
        tap_dots = [jnp.dot(w2[:, k * C1:(k + 1) * C1],
                            taps[:, k * LANE:k * LANE + L],
                            preferred_element_type=jnp.float32)
                    for k in range(KH * KW)]                                  # 4 independent (6,3)@(3,L)
        c2 = (tap_dots[0] + tap_dots[1]) + (tap_dots[2] + tap_dots[3])        # (6, L)
        p2 = maxpool(bn_relu(c2, g2, be2))                                    # (6, 128)

        # ---- fc2(fc1(flatten)) folded into one affine map: VPU multiply +
        # per-batch masked reductions (no 1-row MXU matmul, no nsel input).
        prod = p2 * wf                                                        # (6, 128)
        lane = jax.lax.broadcasted_iota(jnp.int32, prod.shape, 1)
        col = jax.lax.broadcasted_iota(jnp.int32, (1, n), 1)
        out = jnp.zeros((1, n), jnp.float32)
        for b in range(n):                                                    # n is tiny & static
            seg = jnp.where((lane >= b * PH * PW) & (lane < (b + 1) * PH * PW), prod, 0.0)
            s = jnp.sum(jnp.sum(seg, axis=1, keepdims=True), axis=0, keepdims=True)  # (1, 1)
            out = out + jnp.where(col == b, s, 0.0)
        o_ref[...] = out + bf                                                 # single (1, n) store

    return kernel


@jax.jit
def regression_forward(x, p):
    n = x.shape[0]
    assert n * HO * WO <= LANE and n * PH * PW <= LANE, "lane-block packing bound"
    x = x.astype(jnp.float32)

    # ---- host/XLA-side layout plumbing (outside the kernel) ----
    # conv1 im2col: rows ordered (ci, di, dj), cols ordered (b, io, jo).
    # (Kept host-side per review item 6 -- it fuses to a launch or two.)
    xpad = jnp.pad(x, ((0, 0), (0, 0), (1, 1), (1, 1)))
    taps = [xpad[:, :, di:di + HO, dj:dj + WO] for di in range(KH) for dj in range(KW)]
    a1 = jnp.stack(taps, axis=2).transpose(1, 2, 0, 3, 4).reshape(C_IN * KH * KW, n * HO * WO)

    w1m = p["conv1_w"].reshape(C1, W1_COLS)                         # cols ordered (ci, di, dj)
    w2m = p["conv2_w"].transpose(0, 2, 3, 1).reshape(C2, W2_COLS)   # cols ordered (di, dj, ci)

    # Fold fc2 o fc1 (no nonlinearity between them). Conv biases are dropped:
    # they cancel exactly in the train-mode BatchNorm that follows each conv.
    wf = p["fc1_w"].T @ p["fc2_w"].T                                # (120, 1)
    bf = p["fc1_b"] @ p["fc2_w"].T + p["fc2_b"]                     # (1,)
    wf_tiled = jnp.tile(wf.reshape(C2, PH * PW), (1, n))            # (6, n*PH*PW), torch flatten order

    # One packed weight slab: every region sits inside an (8,128) tile.
    wslab = jnp.zeros((32, LANE), jnp.float32)
    wslab = wslab.at[0:C1, 0:W1_COLS].set(w1m)
    wslab = wslab.at[0:C1, W1_COLS:W1_COLS + 1].set(p["bn1_g"].reshape(C1, 1))
    wslab = wslab.at[0:C1, W1_COLS + 1:W1_COLS + 2].set(p["bn1_b"].reshape(C1, 1))
    wslab = wslab.at[8:8 + C2, 0:W2_COLS].set(w2m)
    wslab = wslab.at[8:8 + C2, W2_COLS:W2_COLS + 1].set(p["bn2_g"].reshape(C2, 1))
    wslab = wslab.at[8:8 + C2, W2_COLS + 1:W2_COLS + 2].set(p["bn2_b"].reshape(C2, 1))
    wslab = wslab.at[16:16 + C2, 0:n * PH * PW].set(wf_tiled)
    wslab = wslab.at[24:25, 0:1].set(bf.reshape(1, 1))

    sel_np, g_off = _sel_slab(n)                                    # jit constant
    sel = jnp.asarray(sel_np)

    vmem = pl.BlockSpec(memory_space=pltpu.MemorySpace.VMEM)
    out = pl.pallas_call(
        _make_kernel(n, g_off),
        out_shape=jax.ShapeDtypeStruct((1, n), jnp.float32),
        in_specs=[vmem, vmem, vmem],
        out_specs=vmem,
    )(a1, sel, wslab)
    return out.reshape(n, 1)


def make_params(key):
    ks = jax.random.split(key, 12)
    return dict(
        conv1_w=0.2 * jax.random.normal(ks[0], (C1, C_IN, KH, KW), jnp.float32),
        conv1_b=0.1 * jax.random.normal(ks[1], (C1,), jnp.float32),
        bn1_g=1.0 + 0.1 * jax.random.normal(ks[2], (C1,), jnp.float32),
        bn1_b=0.1 * jax.random.normal(ks[3], (C1,), jnp.float32),
        conv2_w=0.2 * jax.random.normal(ks[4], (C2, C1, KH, KW), jnp.float32),
        conv2_b=0.1 * jax.random.normal(ks[5], (C2,), jnp.float32),
        bn2_g=1.0 + 0.1 * jax.random.normal(ks[6], (C2,), jnp.float32),
        bn2_b=0.1 * jax.random.normal(ks[7], (C2,), jnp.float32),
        fc1_w=0.1 * jax.random.normal(ks[8], (60, 120), jnp.float32),
        fc1_b=0.1 * jax.random.normal(ks[9], (60,), jnp.float32),
        fc2_w=0.1 * jax.random.normal(ks[10], (1, 60), jnp.float32),
        fc2_b=0.1 * jax.random.normal(ks[11], (1,), jnp.float32),
    )


def reference_forward(x, p):
    """Pure-JAX reference mirroring the PyTorch forward (train-mode BN, unfused FCs, with conv biases)."""
    def conv(x, w, b):
        y = jax.lax.conv_general_dilated(
            x, w, window_strides=(1, 1), padding=((1, 1), (1, 1)),
            dimension_numbers=("NCHW", "OIHW", "NCHW"))
        return y + b[None, :, None, None]

    def bn(x, g, b):
        mean = jnp.mean(x, axis=(0, 2, 3), keepdims=True)
        var = jnp.mean((x - mean) ** 2, axis=(0, 2, 3), keepdims=True)
        return g[None, :, None, None] * (x - mean) / jnp.sqrt(var + EPS) + b[None, :, None, None]

    def pool(x):
        return jnp.maximum(
            jnp.maximum(x[:, :, :-1, :-1], x[:, :, :-1, 1:]),
            jnp.maximum(x[:, :, 1:, :-1], x[:, :, 1:, 1:]))

    h1 = pool(jax.nn.relu(bn(conv(x, p["conv1_w"], p["conv1_b"]), p["bn1_g"], p["bn1_b"])))
    h2 = pool(jax.nn.relu(bn(conv(h1, p["conv2_w"], p["conv2_b"]), p["bn2_g"], p["bn2_b"])))
    flat = h2.reshape(h2.shape[0], -1)
    hid = flat @ p["fc1_w"].T + p["fc1_b"]
    return hid @ p["fc2_w"].T + p["fc2_b"]


if __name__ == "__main__":
    key = jax.random.PRNGKey(0)
    kx, kp = jax.random.split(key)
    x = jax.random.normal(kx, (N, C_IN, H, W), jnp.float32)
    params = make_params(kp)

    out = jax.block_until_ready(regression_forward(x, params))
    ref = jax.block_until_ready(reference_forward(x, params))
    assert out.shape == (N, 1), out.shape
    if not np.allclose(np.asarray(out), np.asarray(ref), rtol=1e-2, atol=1e-2):
        raise AssertionError(f"mismatch: kernel={np.asarray(out)} ref={np.asarray(ref)}")
    print("KERNEL_OK")
</pallas_src>

<mosaic_0001>
module attributes {stable_mosaic.version = 11 : i64} {
  func.func @kernel(%arg0: memref<24x60xf32, #tpu.memory_space<vmem>>, %arg1: memref<104x512xf32, #tpu.memory_space<vmem>>, %arg2: memref<32x128xf32, #tpu.memory_space<vmem>>, %arg3: memref<1x2xf32, #tpu.memory_space<vmem>>) attributes {dimension_semantics = [], scalar_prefetch = 0 : i64, scratch_operands = 0 : i64, tpu.core_type = #tpu.core_type<tc>} {
    %c0 = arith.constant 0 : index
    %c0_0 = arith.constant 0 : index
    %0 = vector.load %arg1[%c0, %c0_0] : memref<104x512xf32, #tpu.memory_space<vmem>>, vector<60x512xf32>
    %c64 = arith.constant 64 : index
    %c0_1 = arith.constant 0 : index
    %1 = vector.load %arg1[%c64, %c0_1] : memref<104x512xf32, #tpu.memory_space<vmem>>, vector<40x512xf32>
    %c0_2 = arith.constant 0 : index
    %c0_3 = arith.constant 0 : index
    %2 = vector.load %arg2[%c0_2, %c0_3] : memref<32x128xf32, #tpu.memory_space<vmem>>, vector<3x24xf32>
    %c0_4 = arith.constant 0 : index
    %c24 = arith.constant 24 : index
    %3 = vector.load %arg2[%c0_4, %c24] : memref<32x128xf32, #tpu.memory_space<vmem>>, vector<3x1xf32>
    %c0_5 = arith.constant 0 : index
    %c25 = arith.constant 25 : index
    %4 = vector.load %arg2[%c0_5, %c25] : memref<32x128xf32, #tpu.memory_space<vmem>>, vector<3x1xf32>
    %c8 = arith.constant 8 : index
    %c0_6 = arith.constant 0 : index
    %5 = vector.load %arg2[%c8, %c0_6] : memref<32x128xf32, #tpu.memory_space<vmem>>, vector<6x12xf32>
    %c8_7 = arith.constant 8 : index
    %c12 = arith.constant 12 : index
    %6 = vector.load %arg2[%c8_7, %c12] : memref<32x128xf32, #tpu.memory_space<vmem>>, vector<6x1xf32>
    %c8_8 = arith.constant 8 : index
    %c13 = arith.constant 13 : index
    %7 = vector.load %arg2[%c8_8, %c13] : memref<32x128xf32, #tpu.memory_space<vmem>>, vector<6x1xf32>
    %c16 = arith.constant 16 : index
    %c0_9 = arith.constant 0 : index
    %8 = vector.load %arg2[%c16, %c0_9] : memref<32x128xf32, #tpu.memory_space<vmem>>, vector<6x128xf32>
    %c24_10 = arith.constant 24 : index
    %c0_11 = arith.constant 0 : index
    %9 = vector.load %arg2[%c24_10, %c0_11] : memref<32x128xf32, #tpu.memory_space<vmem>>, vector<1x1xf32>
    %c0_12 = arith.constant 0 : index
    %c0_13 = arith.constant 0 : index
    %10 = vector.load %arg0[%c0_12, %c0_13] : memref<24x60xf32, #tpu.memory_space<vmem>>, vector<24x60xf32>
    %cst = arith.constant dense<0.000000e+00> : vector<3x60xf32>
    %11 = tpu.matmul %2, %10, %cst {dimension_numbers = #tpu.dot_dimension_numbers<[1], [0], [0], [1], [0, 0, 1, 1], [], []>} : vector<3x24xf32>, vector<24x60xf32>, vector<3x60xf32> -> vector<3x60xf32>
    %cst_14 = arith.constant dense<0.000000e+00> : vector<3xf32>
    %12 = vector.multi_reduction <add>, %11, %cst_14 [1] : vector<3x60xf32> to vector<3xf32>
    %13 = vector.shape_cast %12 : vector<3xf32> to vector<3x1xf32>
    %cst_15 = arith.constant 0.0166666675 : f32
    %14 = vector.broadcast %cst_15 : f32 to vector<3x1xf32>
    %15 = arith.mulf %13, %14 : vector<3x1xf32>
    %16 = arith.mulf %11, %11 : vector<3x60xf32>
    %cst_16 = arith.constant dense<0.000000e+00> : vector<3xf32>
    %17 = vector.multi_reduction <add>, %16, %cst_16 [1] : vector<3x60xf32> to vector<3xf32>
    %18 = vector.shape_cast %17 : vector<3xf32> to vector<3x1xf32>
    %cst_17 = arith.constant 0.0166666675 : f32
    %19 = vector.broadcast %cst_17 : f32 to vector<3x1xf32>
    %20 = arith.mulf %18, %19 : vector<3x1xf32>
    %21 = arith.mulf %15, %15 : vector<3x1xf32>
    %22 = arith.subf %20, %21 : vector<3x1xf32>
    %cst_18 = arith.constant 0.000000e+00 : f32
    %23 = vector.broadcast %cst_18 : f32 to vector<3x1xf32>
    %24 = arith.maximumf %22, %23 : vector<3x1xf32>
    %25 = vector.broadcast %15 : vector<3x1xf32> to vector<3x60xf32>
    %26 = arith.subf %11, %25 : vector<3x60xf32>
    %cst_19 = arith.constant 9.99999974E-6 : f32
    %27 = vector.broadcast %cst_19 : f32 to vector<3x1xf32>
    %28 = arith.addf %24, %27 : vector<3x1xf32>
    %29 = math.rsqrt %28 : vector<3x1xf32>
    %30 = arith.mulf %3, %29 : vector<3x1xf32>
    %31 = vector.broadcast %30 : vector<3x1xf32> to vector<3x60xf32>
    %32 = arith.mulf %26, %31 : vector<3x60xf32>
    %33 = vector.broadcast %4 : vector<3x1xf32> to vector<3x60xf32>
    %34 = arith.addf %32, %33 : vector<3x60xf32>
    %cst_20 = arith.constant 0.000000e+00 : f32
    %35 = vector.broadcast %cst_20 : f32 to vector<3x60xf32>
    %36 = arith.maximumf %34, %35 : vector<3x60xf32>
    %cst_21 = arith.constant dense<0.000000e+00> : vector<3x512xf32>
    %37 = tpu.matmul %36, %0, %cst_21 {dimension_numbers = #tpu.dot_dimension_numbers<[1], [0], [0], [1], [0, 0, 1, 1], [], []>} : vector<3x60xf32>, vector<60x512xf32>, vector<3x512xf32> -> vector<3x512xf32>
    %38 = vector.extract_strided_slice %37 {offsets = [0, 0], sizes = [3, 128], strides = [1, 1]} : vector<3x512xf32> to vector<3x128xf32>
    %39 = vector.extract_strided_slice %37 {offsets = [0, 128], sizes = [3, 128], strides = [1, 1]} : vector<3x512xf32> to vector<3x128xf32>
    %40 = arith.maximumf %38, %39 : vector<3x128xf32>
    %41 = vector.extract_strided_slice %37 {offsets = [0, 256], sizes = [3, 128], strides = [1, 1]} : vector<3x512xf32> to vector<3x128xf32>
    %42 = vector.extract_strided_slice %37 {offsets = [0, 384], sizes = [3, 128], strides = [1, 1]} : vector<3x512xf32> to vector<3x128xf32>
    %43 = arith.maximumf %41, %42 : vector<3x128xf32>
    %44 = arith.maximumf %40, %43 : vector<3x128xf32>
    %45 = vector.extract_strided_slice %44 {offsets = [0, 0], sizes = [3, 40], strides = [1, 1]} : vector<3x128xf32> to vector<3x40xf32>
    %cst_22 = arith.constant dense<0.000000e+00> : vector<3x512xf32>
    %46 = tpu.matmul %45, %1, %cst_22 {dimension_numbers = #tpu.dot_dimension_numbers<[1], [0], [0], [1], [0, 0, 1, 1], [], []>} : vector<3x40xf32>, vector<40x512xf32>, vector<3x512xf32> -> vector<3x512xf32>
    %47 = vector.extract_strided_slice %5 {offsets = [0, 0], sizes = [6, 3], strides = [1, 1]} : vector<6x12xf32> to vector<6x3xf32>
    %48 = vector.extract_strided_slice %46 {offsets = [0, 0], sizes = [3, 60], strides = [1, 1]} : vector<3x512xf32> to vector<3x60xf32>
    %cst_23 = arith.constant dense<0.000000e+00> : vector<6x60xf32>
    %49 = tpu.matmul %47, %48, %cst_23 {dimension_numbers = #tpu.dot_dimension_numbers<[1], [0], [0], [1], [0, 0, 1, 1], [], []>} : vector<6x3xf32>, vector<3x60xf32>, vector<6x60xf32> -> vector<6x60xf32>
    %50 = vector.extract_strided_slice %5 {offsets = [0, 3], sizes = [6, 3], strides = [1, 1]} : vector<6x12xf32> to vector<6x3xf32>
    %51 = vector.extract_strided_slice %46 {offsets = [0, 128], sizes = [3, 60], strides = [1, 1]} : vector<3x512xf32> to vector<3x60xf32>
    %cst_24 = arith.constant dense<0.000000e+00> : vector<6x60xf32>
    %52 = tpu.matmul %50, %51, %cst_24 {dimension_numbers = #tpu.dot_dimension_numbers<[1], [0], [0], [1], [0, 0, 1, 1], [], []>} : vector<6x3xf32>, vector<3x60xf32>, vector<6x60xf32> -> vector<6x60xf32>
    %53 = vector.extract_strided_slice %5 {offsets = [0, 6], sizes = [6, 3], strides = [1, 1]} : vector<6x12xf32> to vector<6x3xf32>
    %54 = vector.extract_strided_slice %46 {offsets = [0, 256], sizes = [3, 60], strides = [1, 1]} : vector<3x512xf32> to vector<3x60xf32>
    %cst_25 = arith.constant dense<0.000000e+00> : vector<6x60xf32>
    %55 = tpu.matmul %53, %54, %cst_25 {dimension_numbers = #tpu.dot_dimension_numbers<[1], [0], [0], [1], [0, 0, 1, 1], [], []>} : vector<6x3xf32>, vector<3x60xf32>, vector<6x60xf32> -> vector<6x60xf32>
    %56 = vector.extract_strided_slice %5 {offsets = [0, 9], sizes = [6, 3], strides = [1, 1]} : vector<6x12xf32> to vector<6x3xf32>
    %57 = vector.extract_strided_slice %46 {offsets = [0, 384], sizes = [3, 60], strides = [1, 1]} : vector<3x512xf32> to vector<3x60xf32>
    %cst_26 = arith.constant dense<0.000000e+00> : vector<6x60xf32>
    %58 = tpu.matmul %56, %57, %cst_26 {dimension_numbers = #tpu.dot_dimension_numbers<[1], [0], [0], [1], [0, 0, 1, 1], [], []>} : vector<6x3xf32>, vector<3x60xf32>, vector<6x60xf32> -> vector<6x60xf32>
    %59 = arith.addf %49, %52 : vector<6x60xf32>
    %60 = arith.addf %55, %58 : vector<6x60xf32>
    %61 = arith.addf %59, %60 : vector<6x60xf32>
    %cst_27 = arith.constant dense<0.000000e+00> : vector<6xf32>
    %62 = vector.multi_reduction <add>, %61, %cst_27 [1] : vector<6x60xf32> to vector<6xf32>
    %63 = vector.shape_cast %62 : vector<6xf32> to vector<6x1xf32>
    %cst_28 = arith.constant 0.0166666675 : f32
    %64 = vector.broadcast %cst_28 : f32 to vector<6x1xf32>
    %65 = arith.mulf %63, %64 : vector<6x1xf32>
    %66 = arith.mulf %61, %61 : vector<6x60xf32>
    %cst_29 = arith.constant dense<0.000000e+00> : vector<6xf32>
    %67 = vector.multi_reduction <add>, %66, %cst_29 [1] : vector<6x60xf32> to vector<6xf32>
    %68 = vector.shape_cast %67 : vector<6xf32> to vector<6x1xf32>
    %cst_30 = arith.constant 0.0166666675 : f32
    %69 = vector.broadcast %cst_30 : f32 to vector<6x1xf32>
    %70 = arith.mulf %68, %69 : vector<6x1xf32>
    %71 = arith.mulf %65, %65 : vector<6x1xf32>
    %72 = arith.subf %70, %71 : vector<6x1xf32>
    %cst_31 = arith.constant 0.000000e+00 : f32
    %73 = vector.broadcast %cst_31 : f32 to vector<6x1xf32>
    %74 = arith.maximumf %72, %73 : vector<6x1xf32>
    %75 = vector.broadcast %65 : vector<6x1xf32> to vector<6x60xf32>
    %76 = arith.subf %61, %75 : vector<6x60xf32>
    %cst_32 = arith.constant 9.99999974E-6 : f32
    %77 = vector.broadcast %cst_32 : f32 to vector<6x1xf32>
    %78 = arith.addf %74, %77 : vector<6x1xf32>
    %79 = math.rsqrt %78 : vector<6x1xf32>
    %80 = arith.mulf %6, %79 : vector<6x1xf32>
    %81 = vector.broadcast %80 : vector<6x1xf32> to vector<6x60xf32>
    %82 = arith.mulf %76, %81 : vector<6x60xf32>
    %83 = vector.broadcast %7 : vector<6x1xf32> to vector<6x60xf32>
    %84 = arith.addf %82, %83 : vector<6x60xf32>
    %cst_33 = arith.constant 0.000000e+00 : f32
    %85 = vector.broadcast %cst_33 : f32 to vector<6x60xf32>
    %86 = arith.maximumf %84, %85 : vector<6x60xf32>
    %cst_34 = arith.constant dense<0.000000e+00> : vector<6x512xf32>
    %87 = tpu.matmul %86, %0, %cst_34 {dimension_numbers = #tpu.dot_dimension_numbers<[1], [0], [0], [1], [0, 0, 1, 1], [], []>} : vector<6x60xf32>, vector<60x512xf32>, vector<6x512xf32> -> vector<6x512xf32>
    %88 = vector.extract_strided_slice %87 {offsets = [0, 0], sizes = [6, 128], strides = [1, 1]} : vector<6x512xf32> to vector<6x128xf32>
    %89 = vector.extract_strided_slice %87 {offsets = [0, 128], sizes = [6, 128], strides = [1, 1]} : vector<6x512xf32> to vector<6x128xf32>
    %90 = arith.maximumf %88, %89 : vector<6x128xf32>
    %91 = vector.extract_strided_slice %87 {offsets = [0, 256], sizes = [6, 128], strides = [1, 1]} : vector<6x512xf32> to vector<6x128xf32>
    %92 = vector.extract_strided_slice %87 {offsets = [0, 384], sizes = [6, 128], strides = [1, 1]} : vector<6x512xf32> to vector<6x128xf32>
    %93 = arith.maximumf %91, %92 : vector<6x128xf32>
    %94 = arith.maximumf %90, %93 : vector<6x128xf32>
    %95 = arith.mulf %94, %8 : vector<6x128xf32>
    %96 = tpu.iota {dimensions = array<i32: 1>} : vector<6x128xi32>
    %97 = tpu.iota {dimensions = array<i32: 1>} : vector<1x2xi32>
    %cst_35 = arith.constant 0.000000e+00 : f32
    %98 = vector.broadcast %cst_35 : f32 to vector<1x2xf32>
    %c0_i32 = arith.constant 0 : i32
    %99 = vector.broadcast %c0_i32 : i32 to vector<6x128xi32>
    %100 = arith.cmpi sge, %96, %99 : vector<6x128xi32>
    %c20_i32 = arith.constant 20 : i32
    %101 = vector.broadcast %c20_i32 : i32 to vector<6x128xi32>
    %102 = arith.cmpi slt, %96, %101 : vector<6x128xi32>
    %103 = arith.andi %100, %102 : vector<6x128xi1>
    %cst_36 = arith.constant 0.000000e+00 : f32
    %104 = vector.broadcast %cst_36 : f32 to vector<6x128xf32>
    %105 = arith.select %103, %95, %104 : vector<6x128xi1>, vector<6x128xf32>
    %cst_37 = arith.constant dense<0.000000e+00> : vector<6xf32>
    %106 = vector.multi_reduction <add>, %105, %cst_37 [1] : vector<6x128xf32> to vector<6xf32>
    %107 = vector.shape_cast %106 : vector<6xf32> to vector<6x1xf32>
    %cst_38 = arith.constant dense<0.000000e+00> : vector<1xf32>
    %108 = vector.multi_reduction <add>, %107, %cst_38 [0] : vector<6x1xf32> to vector<1xf32>
    %109 = vector.shape_cast %108 : vector<1xf32> to vector<1x1xf32>
    %c0_i32_39 = arith.constant 0 : i32
    %110 = vector.broadcast %c0_i32_39 : i32 to vector<1x2xi32>
    %111 = arith.cmpi eq, %97, %110 : vector<1x2xi32>
    %cst_40 = arith.constant 0.000000e+00 : f32
    %112 = vector.shape_cast %109 : vector<1x1xf32> to vector<1x1xf32>
    %113 = vector.broadcast %112 : vector<1x1xf32> to vector<1x2xf32>
    %114 = vector.broadcast %cst_40 : f32 to vector<1x2xf32>
    %115 = arith.select %111, %113, %114 : vector<1x2xi1>, vector<1x2xf32>
    %116 = arith.addf %98, %115 : vector<1x2xf32>
    %c20_i32_41 = arith.constant 20 : i32
    %117 = vector.broadcast %c20_i32_41 : i32 to vector<6x128xi32>
    %118 = arith.cmpi sge, %96, %117 : vector<6x128xi32>
    %c40_i32 = arith.constant 40 : i32
    %119 = vector.broadcast %c40_i32 : i32 to vector<6x128xi32>
    %120 = arith.cmpi slt, %96, %119 : vector<6x128xi32>
    %121 = arith.andi %118, %120 : vector<6x128xi1>
    %cst_42 = arith.constant 0.000000e+00 : f32
    %122 = vector.broadcast %cst_42 : f32 to vector<6x128xf32>
    %123 = arith.select %121, %95, %122 : vector<6x128xi1>, vector<6x128xf32>
    %cst_43 = arith.constant dense<0.000000e+00> : vector<6xf32>
    %124 = vector.multi_reduction <add>, %123, %cst_43 [1] : vector<6x128xf32> to vector<6xf32>
    %125 = vector.shape_cast %124 : vector<6xf32> to vector<6x1xf32>
    %cst_44 = arith.constant dense<0.000000e+00> : vector<1xf32>
    %126 = vector.multi_reduction <add>, %125, %cst_44 [0] : vector<6x1xf32> to vector<1xf32>
    %127 = vector.shape_cast %126 : vector<1xf32> to vector<1x1xf32>
    %c1_i32 = arith.constant 1 : i32
    %128 = vector.broadcast %c1_i32 : i32 to vector<1x2xi32>
    %129 = arith.cmpi eq, %97, %128 : vector<1x2xi32>
    %cst_45 = arith.constant 0.000000e+00 : f32
    %130 = vector.shape_cast %127 : vector<1x1xf32> to vector<1x1xf32>
    %131 = vector.broadcast %130 : vector<1x1xf32> to vector<1x2xf32>
    %132 = vector.broadcast %cst_45 : f32 to vector<1x2xf32>
    %133 = arith.select %129, %131, %132 : vector<1x2xi1>, vector<1x2xf32>
    %134 = arith.addf %116, %133 : vector<1x2xf32>
    %135 = vector.broadcast %9 : vector<1x1xf32> to vector<1x2xf32>
    %136 = arith.addf %134, %135 : vector<1x2xf32>
    %c0_46 = arith.constant 0 : index
    %c0_47 = arith.constant 0 : index
    %137 = vector.load %arg3[%c0_46, %c0_47] : memref<1x2xf32, #tpu.memory_space<vmem>>, vector<1x2xf32>
    tpu.vector_store %arg3[%c0_46, %c0_47], %136 {strides = array<i32>} : memref<1x2xf32, #tpu.memory_space<vmem>>, vector<1x2xf32>,
    return
  }
}

</mosaic_0001>

<bundles_post_ra>
// kernel: regression_forward.1
= control target key start
LH: loop header
LB: loop body
LE: loop exit
PB: predicated region body
PF: predicated region fallthrough
CT: control target
= control target key end

     0   :  { %v1239_v2 = vmov 0.0|0.0   ;;  %vm1240_vm0 = vmmov 0   ;;  %v1241_v4 = vmov 0.0   ;;  %s1597_s0 = inlined_call_operand.vmem [shape: f32[24,60], index: 0, kind: input, shape index: {}]   ;;  %s1598_s1 = inlined_call_operand.vmem [shape: f32[104,512], index: 1, kind: input, shape index: {}]   ;;  %s1599_s2 = inlined_call_operand.vmem [shape: f32[32,128], index: 2, kind: input, shape index: {}]   ;;  %s1600_s3 = inlined_call_operand.hbm [shape: f32[1,2], index: 3, kind: output, shape index: {}]  }
   0x1   :  { %v71_v0 = vld [vmem:[%s1597_s0] sm:$0xff]  ;;  %v72_v1 = vld [vmem:[%s1597_s0 + $0x8] sm:$0xff]  ;;  %1096 = vmatprep.subr.bf16.mxu0 %v1239_v2  ;;  %1073 = vmatprep.mubr.msk.f32.mxu0 %vm1240_vm0, %v1241_v4 }
   0x2   :  { %v1097_v3 = vpack.c.bf16 %v72_v1, %v71_v0 }
   0x3   :  { %8 = vsyncpa [#allocation3], 0  ;;  %258 = vmatprep.mubr.f32.mxu1 %v1241_v4  ;;  %v73_v5 = vld [vmem:[%s1597_s0 + $0x10] sm:$0xff]  ;;  %v1288_v6 = vld [vmem:[%s1599_s2] sm:$0x7]  ;;  %vm74_vm1 = vcmask 195584  }
   0x4   :  { %1098 = vmatpush3.bf16.msra.mxu0 %v1097_v3  ;;  %vm148_vm2 = vcmask 485376   ;;  %v1242_v12 = vmov 24   ;;  %v16_v13 = vld [vmem:[%s1598_s1 + $0x8] sm:$0xff]  ;;  %v18_v15 = vld [vmem:[%s1598_s1 + $0x18] sm:$0xff]  ;;  %v15_v18 = vld [vmem:[%s1598_s1] sm:$0xff]  ;;  %vm181_vm3 = vcmask 1043456  }
   0x5   :  { %1071 = vmatprep.subr.mxu0 %v1241_v4  ;;  %1205 = vset.pattern.permute.xlu1 %v1242_v12  ;;  %v20_v14 = vld [vmem:[%s1598_s1 + $0x28] sm:$0xff]  ;;  %v22_v17 = vld [vmem:[%s1598_s1 + $0x38] sm:$0xff]  ;;  %v19_v19 = vld [vmem:[%s1598_s1 + $0x20] sm:$0xff]  ;;  %v1243_v3 = vmov 25   ;;  %vm1244_vm4 = vmmov 1   ;;  %vm177_vm6 = vcmask 490496  }
   0x6   :  { %v1306_v16 = vpack.c.bf16 %v20_v14, %v16_v13  ;;  %v1317_v20 = vpack.c.bf16 %v22_v17, %v18_v15  ;;  %v1319_v21 = vpack.c.bf16 %v19_v19, %v15_v18  ;;  %v17_v22 = vld [vmem:[%s1598_s1 + $0x10] sm:$0xff]  ;;  %v24_v24 = vld [vmem:[%s1598_s1 + $0x48] sm:$0xff]  ;;  %v26_v27 = vld [vmem:[%s1598_s1 + $0x58] sm:$0xff]  ;;  %s1245_s14 = smov 119   ;;  %s1246_s15 = smov 125   ;;  %vm339_vm7 = vcmask 326656  }
   0x7   :  { %v21_v23 = vld [vmem:[%s1598_s1 + $0x30] sm:$0xff]  ;;  %v28_v26 = vld [vmem:[%s1598_s1 + $0x68] sm:$0xff]  ;;  %v30_v28 = vld [vmem:[%s1598_s1 + $0x78] sm:$0xff]  ;;  %s1247_s16 = smov 122   ;;  %vm491_vm8 = vcmask 1042432   ;;  %vm488_vm9 = vcmask 23552  }
   0x8   :  { %1072 = vmatpush3.msra.mxu0 %v73_v5  ;;  %1100 = vmatprep.subr.bf16.mxu1 %v1306_v16  ;;  %v1331_v25 = vpack.c.bf16 %v21_v23, %v17_v22  ;;  %v1344_v29 = vpack.c.bf16 %v28_v26, %v24_v24  ;;  %v1346_v30 = vpack.c.bf16 %v30_v28, %v26_v27  ;;  %v23_v31 = vld [vmem:[%s1598_s1 + $0x40] sm:$0xff]  ;;  %v25_v33 = vld [vmem:[%s1598_s1 + $0x50] sm:$0xff]  ;;  %v32_v48 = vld [vmem:[%s1598_s1 + $0x88] sm:$0xff]  ;;  %vm795_vm10 = vcmask 488448  }
   0x9   :  { %1074 = vmatmul.mubr.msk.f32.vlgmr.msra.gmra.mrb[0].mxu0 %vm74_vm1, %v1288_v6  ;;  %1118 = vmatprep.subr.bf16.mxu0 %v1317_v20  ;;  %v27_v32 = vld [vmem:[%s1598_s1 + $0x60] sm:$0xff]  ;;  %v29_v35 = vld [vmem:[%s1598_s1 + $0x70] sm:$0xff]  ;;  %v36_v49 = vld [vmem:[%s1598_s1 + $0xa8] sm:$0xff]  ;;  %vm979_vm15 = vcmask 1045504  }
   0xa   :  { %329 = vmatprep.mubr.f32.mxu0 %v1241_v4  ;;  %1102 = vmatpush1.bf16.msra.mxu1 %v1319_v21  ;;  %v1358_v34 = vpack.c.bf16 %v27_v32, %v23_v31  ;;  %v1365_v36 = vpack.c.bf16 %v29_v35, %v25_v33  ;;  %v34_v50 = vld [vmem:[%s1598_s1 + $0x98] sm:$0xff]  ;;  %v1380_v51 = vpack.c.bf16 %v36_v49, %v32_v48  ;;  %v31_v53 = vld [vmem:[%s1598_s1 + $0x80] sm:$0xff]  ;;  %v33_v57 = vld [vmem:[%s1598_s1 + $0x90] sm:$0xff] }
   0xb   :  { %1120 = vmatpush1.bf16.msra.mxu0 %v1331_v25  ;;  %1104 = vmatprep.subr.bf16.mxu1 %v1344_v29  ;;  %v38_v52 = vld [vmem:[%s1598_s1 + $0xb8] sm:$0xff]  ;;  %v35_v54 = vld [vmem:[%s1598_s1 + $0xa0] sm:$0xff]  ;;  %v37_v58 = vld [vmem:[%s1598_s1 + $0xb0] sm:$0xff] }
   0xc   :  { %1122 = vmatprep.subr.bf16.mxu0 %v1346_v30  ;;  %v1391_v55 = vpack.c.bf16 %v38_v52, %v34_v50  ;;  %v1393_v56 = vpack.c.bf16 %v35_v54, %v31_v53  ;;  %v1402_v59 = vpack.c.bf16 %v37_v58, %v33_v57  ;;  %v40_v60 = vld [vmem:[%s1598_s1 + $0xc8] sm:$0xff]  ;;  %v42_v62 = vld [vmem:[%s1598_s1 + $0xd8] sm:$0xff]  ;;  %v39_v1 = vld [vmem:[%s1598_s1 + $0xc0] sm:$0xff] }
   0xd   :  { %v44_v61 = vld [vmem:[%s1598_s1 + $0xe8] sm:$0xf]  ;;  %v46_v0 = vld [vmem:[%s1598_s1 + $0xf8] sm:$0xf]  ;;  %v41_v2 = vld [vmem:[%s1598_s1 + $0xd0] sm:$0xff] }
   0xe   :  { %1106 = vmatpush1.bf16.msra.mxu1 %v1358_v34  ;;  %v1416_v63 = vpack.c.bf16 %v44_v61, %v40_v60  ;;  %vm1427_vm5 = vmpackc.low %vm181_vm3, %vm1244_vm4  ;;  %v52_v12 = vld [vmem:[%s1598_s1 + $0x128] sm:$0xff]  ;;  %v50_v13 = vld [vmem:[%s1598_s1 + $0x118] sm:$0xff] }
   0xf   :  { %1124 = vmatpush1.bf16.msra.mxu0 %v1365_v36  ;;  %1108 = vmatprep.subr.bf16.mxu1 %v1380_v51  ;;  %v54_v15 = vld [vmem:[%s1598_s1 + $0x138] sm:$0xff]  ;;  %v47_v19 = vld [vmem:[%s1598_s1 + $0x100] sm:$0xff]  ;;  %v49_v24 = vld [vmem:[%s1598_s1 + $0x110] sm:$0xff] }
  0x10   :  { %1126 = vmatprep.subr.bf16.mxu0 %v1391_v55  ;;  %v1143_v17 = vpack.c.bf16 %v54_v15, %v50_v13  ;;  %v51_v23 = vld [vmem:[%s1598_s1 + $0x120] sm:$0xff]  ;;  %v53_v26 = vld [vmem:[%s1598_s1 + $0x130] sm:$0xff]  ;;  %v56_v35 = vld [vmem:[%s1598_s1 + $0x148] sm:$0xff] }
  0x11   :  { %v1137_v31 = vpack.c.bf16 %v51_v23, %v47_v19  ;;  %v1145_v32 = vpack.c.bf16 %v53_v26, %v49_v24  ;;  %v64_v48 = vld [vmem:[%s1598_s1 + $0x188] sm:$0xff]  ;;  %v66_v49 = vld [vmem:[%s1598_s1 + $0x198] sm:$0xff]  ;;  %v63_v50 = vld [vmem:[%s1598_s1 + $0x180] sm:$0xff]  ;;  %v1250_v24 = vmov 0   ;;  %v973_v26 = vlaneseq }
  0x12   :  { %1110 = vmatpush1.bf16.msra.mxu1 %v1393_v56  ;;  %v65_v52 = vld [vmem:[%s1598_s1 + $0x190] sm:$0xff]  ;;  %v1523_v53 = vld [vmem:[%s1599_s2 + $0x8] sm:$0x3f] }
  0x13   :  { %1128 = vmatpush1.bf16.msra.mxu0 %v1402_v59  ;;  %1113 = vmatprep.subr.msk.bf16.mxu1 %vm1427_vm5, %v1416_v63 }
  0xdc   :  { %v1292_v7 = vpop.f32.mrb[0].mxu0 }
  0xdd   :  { %v1075_v8 = vpop.f32.mrb[1].mxu0  ;;  %v149_v9 = vsel %vm148_vm2, %v1292_v7, 0.0  ;;  %v153_v10 = vmul.f32 %v1292_v7, %v1292_v7 }
  0xde   :  { %150 = vadd.xlane.f32.xlu0 %v149_v9  ;;  %v43_v8 = vld [vmem:[%s1598_s1 + $0xe0] sm:$0xf]  ;;  %v45_v9 = vld [vmem:[%s1598_s1 + $0xf0] sm:$0xf] }
  0xdf   :  { %v154_v11 = vsel %vm148_vm2, %v153_v10, 0.0  ;;  %v1443_v10 = vpack.c.bf16 %v43_v8, %v39_v1  ;;  %vm1016_vm2 = vcmask 8192  }
  0xe1   :  { %1116 = vmatpush1.bf16.msk.msra.mxu1 %vm1427_vm5, %v1443_v10 }
  0xe2   :  { %155 = vadd.xlane.f32.xlu0 %v154_v11  ;;  %v1445_v11 = vpack.c.bf16 %v45_v9, %v41_v2 }
  0xf8   :  { %565 = vrot.lane.b32.xlu0 %v1523_v53, %s1245_s14 }
 0x16b   :  { %v151_v37 = vpop.xlane.xlu0 %150 }
 0x16c   :  { %v152_v38 = vmul.f32 0.016666668, %v151_v37  ;;  %v60_v37 = vld [vmem:[%s1598_s1 + $0x168] sm:$0xff] }
 0x16e   :  { %v161_v39 = vsub.f32 %v1292_v7, %v152_v38  ;;  %v158_v41 = vmul.f32 %v152_v38, %v152_v38  ;;  %v1431_v7 = vpack.c.bf16 %v46_v0, %v42_v62  ;;  %v58_v38 = vld [vmem:[%s1598_s1 + $0x158] sm:$0xff] }
 0x16f   :  { %v156_v40 = vpop.xlane.xlu0 %155 }
 0x170   :  { %v157_v42 = vmul.f32 0.016666668, %v156_v40  ;;  %1131 = vmatprep.subr.msk.bf16.mxu0 %vm1427_vm5, %v1431_v7  ;;  %v62_v40 = vld [vmem:[%s1598_s1 + $0x178] sm:$0xff] }
 0x171   :  { %1134 = vmatpush1.bf16.msk.msra.mxu0 %vm1427_vm5, %v1445_v11 }
 0x172   :  { %v159_v43 = vsub.f32 %v157_v42, %v158_v41  ;;  %1144 = vmatprep.subr.bf16.mxu0 %v1143_v17  ;;  %v55_v41 = vld [vmem:[%s1598_s1 + $0x140] sm:$0xff] }
 0x173   :  { %v59_v42 = vld [vmem:[%s1598_s1 + $0x160] sm:$0xff]  ;;  %v566_v1 = vpop.permute.xlu0 %565 }
 0x174   :  { %v160_v44 = vmax.f32 %v159_v43, 0.0  ;;  %v1147_v43 = vpack.c.bf16 %v62_v40, %v58_v38  ;;  %v69_v38 = vld [vmem:[%s1599_s2 + $0x10] sm:$0x3f] }
 0x176   :  { %v162_v45 = vadd.f32 1e-05, %v160_v44  ;;  %v1141_v44 = vpack.c.bf16 %v59_v42, %v55_v41 }
 0x178   :  { %1211 = vrsqrt.f32 %v162_v45  ;;  %v57_v45 = vld [vmem:[%s1598_s1 + $0x150] sm:$0xff] }
 0x182   :  { %v1212_v46 = vpop.eup %1211 }
 0x183   :  { %v164_v47 = vmul.f32 %v1212_v46, %v1288_v6  ;;  %v61_v46 = vld [vmem:[%s1598_s1 + $0x170] sm:$0xff] }
 0x185   :  { %167 = vperm.xlu1 %1205, %v164_v47   ;;  %v1149_v47 = vpack.c.bf16 %v61_v46, %v57_v45  ;;  %v70_v45 = vld [vmem:[%s1599_s2 + $0x18] sm:$0x1]  ;;  %s1251_s2 = smov [#allocation2]  }
 0x186   :  { %s1024_s0 = sshll.u32 %s1251_s2, 4  ;;  %s1025_s0 = int_to_ptr.vmem [resolvable:$true] %s1024_s0 }
 0x187   :  { %s1215_s20 = scalar_lea.vmem %s1025_s0, 16  ;;  %s1219_s21 = scalar_lea.vmem %s1025_s0, 32 }
 0x188   :  { %p1216_p0 = scmp.ne.s32.totalorder %s1025_s0, %s1215_s20  ;;  %p1220_p1 = scmp.lt.s32.totalorder %s1025_s0, %s1025_s0 }
 0x189   :  { %1206 = vset.pattern.permute.xlu1 %v1243_v3  ;;  %p1221_p2 = scmp.lt.s32.totalorder %s1219_s21, %s1215_s20 }
 0x18a   :  { %172 = vperm.xlu1 %1206, %v1288_v6   ;;  %v48_v6 = vld [vmem:[%s1598_s1 + $0x108] sm:$0xff] }
 0x18b   :  { %v1135_v14 = vpack.c.bf16 %v52_v12, %v48_v6  ;;  %p1222_p3 = por %p1221_p2, %p1220_p1 }
 0x18d   :  { %1136 = vmatprep.subr.bf16.mxu1 %v1135_v14  ;;  %p1223_p4 = pnand %p1222_p3, %p1216_p0 }
 0x18e   :  { %486 = vrot.lane.b32.xlu1 %v1523_v53, %s1246_s15 }
 0x192   :  { %717 = vrot.lane.b32.xlu1 %v1523_v53, %s1247_s16 }
 0x204   :  { %v168_v18 = vpop.permute.xlu1 %167 }
 0x205   :  { %v170_v22 = vmul.f32 %v168_v18, %v161_v39  ;;  %v1139_v39 = vpack.c.bf16 %v60_v37, %v56_v35 }
 0x209   :  { %v173_v27 = vpop.permute.xlu1 %172 }
 0x20a   :  { %v175_v28 = vadd.f32 %v173_v27, %v170_v22  ;;  %v974_v27 = vand.u32 127, %v973_v26 }
 0x20c   :  { %v176_v33 = vmax.f32 %v175_v28, 0.0  ;;  %vm993_vm11 = vcmp.ge.s32.totalorder %v974_v27, 20  ;;  %vm994_vm12 = vcmp.lt.s32.totalorder %v974_v27, 40  ;;  %vm976_vm14 = vcmp.lt.s32.totalorder %v974_v27, 20 }
 0x20d   :  { %v487_v6 = vpop.permute.xlu1 %486  ;;  %vm995_vm13 = vmand %vm993_vm11, %vm994_vm12  ;;  %vm1007_vm1 = vcmp.eq.s32.totalorder %v974_v27, 1 }
 0x20e   :  { %1035 = vmatmul.mubr.msk.f32.vlgmr.msra.gmra.mrb[0].mxu1 %vm177_vm6, %v176_v33  ;;  %1038 = vmatmul.mubr.msk.f32.vlgmr.msra.gmra.mrb[2].mxu0 %vm177_vm6, %v176_v33 }
 0x20f   :  { %1138 = vmatpush1.bf16.msra.mxu1 %v1137_v31  ;;  %1146 = vmatpush1.bf16.msra.mxu0 %v1145_v32 }
 0x210   :  { %407 = vmatprep.mubr.f32.mxu1 %v1241_v4  ;;  %478 = vmatprep.mubr.f32.mxu0 %v1241_v4 }
 0x211   :  { %1140 = vmatprep.subr.bf16.mxu1 %v1139_v39  ;;  %1148 = vmatprep.subr.bf16.mxu0 %v1147_v43 }
 0x213   :  { %1142 = vmatpush1.bf16.msra.mxu1 %v1141_v44  ;;  %1150 = vmatpush1.bf16.msra.mxu0 %v1149_v47 }
 0x214   :  { %351 = vmatprep.subr.mxu1 %v64_v48  ;;  %422 = vmatprep.subr.mxu0 %v66_v49 }
 0x217   :  { %352 = vmatpush1.msra.mxu1 %v63_v50  ;;  %423 = vmatpush1.msra.mxu0 %v65_v52 }
 0x218   :  { %1081 = vmatprep.subr.mxu1 %v1241_v4  ;;  %1076 = vmatprep.subr.mxu0 %v1241_v4 }
 0x2e1   :  { %v260_v54 = vpop.f32.mrb[0].mxu1  ;;  %v331_v57 = vpop.f32.mrb[2].mxu0 }
 0x2e2   :  { %v262_v58 = vpop.f32.mrb[1].mxu1  ;;  %v333_v60 = vpop.f32.mrb[3].mxu0 }
 0x2e3   :  { %v336_v61 = vmax.f32 %v260_v54, %v262_v58  ;;  %v337_v62 = vmax.f32 %v331_v57, %v333_v60 }
 0x2e5   :  { %v338_v0 = vmax.f32 %v336_v61, %v337_v62 }
 0x2e7   :  { %1039 = vmatmul.mubr.msk.f32.vlgmr.msra.gmra.mrb[2].mxu1 %vm339_vm7, %v338_v0  ;;  %1040 = vmatmul.mubr.msk.f32.vlgmr.msra.gmra.mrb[4].mxu0 %vm339_vm7, %v338_v0 }
 0x2e8   :  { %1083 = vmatprep.mubr.msk.f32.mxu1 %vm1240_vm0, %v1241_v4  ;;  %1078 = vmatprep.mubr.msk.f32.mxu0 %vm1240_vm0, %v1241_v4 }
 0x3ba   :  { %v409_v2 = vpop.f32.mrb[2].mxu1  ;;  %v480_v3 = vpop.f32.mrb[4].mxu0 }
 0x3bb   :  { %v411_v8 = vpop.f32.mrb[3].mxu1  ;;  %v482_v9 = vpop.f32.mrb[5].mxu0 }
 0x3bc   :  { %1077 = vmatpush3.msk.msra.mxu0 %vm491_vm8, %v411_v8  ;;  %1082 = vmatpush3.msk.msra.mxu1 %vm491_vm8, %v482_v9 }
 0x3bd   :  { %1084 = vmatmul.mubr.msk.f32.vlgmr.msra.gmra.mrb[4].mxu1 %vm488_vm9, %v566_v1  ;;  %1086 = vmatprep.subr.mxu1 %v1241_v4 }
 0x3be   :  { %1087 = vmatpush3.msk.msra.mxu1 %vm491_vm8, %v409_v2  ;;  %1088 = vmatprep.mubr.msk.f32.mxu1 %vm1240_vm0, %v1241_v4 }
 0x3bf   :  { %1091 = vmatprep.subr.mxu1 %v1241_v4  ;;  %1079 = vmatmul.mubr.msk.f32.vlgmr.msra.gmra.mrb[6].mxu0 %vm488_vm9, %v487_v6 }
 0x3c0   :  { %1152 = vmatprep.subr.bf16.mxu0 %v1306_v16  ;;  %891 = vmatprep.mubr.f32.mxu0 %v1241_v4  ;;  %v718_v16 = vpop.permute.xlu1 %717 }
 0x3c1   :  { %1154 = vmatpush1.bf16.msra.mxu0 %v1319_v21 }
 0x3c2   :  { %1156 = vmatprep.subr.bf16.mxu0 %v1344_v29 }
 0x3c5   :  { %1089 = vmatmul.mubr.msk.f32.vlgmr.msra.gmra.mrb[4].mxu1 %vm488_vm9, %v1523_v53  ;;  %1158 = vmatpush1.bf16.msra.mxu0 %v1358_v34 }
 0x3c6   :  { %1092 = vmatpush3.msk.msra.mxu1 %vm491_vm8, %v480_v3  ;;  %1093 = vmatprep.mubr.msk.f32.mxu1 %vm1240_vm0, %v1241_v4  ;;  %vm990_vm0 = vcmp.eq.s32.totalorder %v974_v27, 0 }
 0x3c7   :  { %1170 = vmatprep.subr.bf16.mxu1 %v1317_v20  ;;  %1160 = vmatprep.subr.bf16.mxu0 %v1380_v51  ;;  %v1248_v51 = vmov 12  }
 0x3c8   :  { %1207 = vset.pattern.permute.xlu1 %v1248_v51 }
 0x3c9   :  { %1162 = vmatpush1.bf16.msra.mxu0 %v1393_v56 }
 0x3ca   :  { %1165 = vmatprep.subr.msk.bf16.mxu0 %vm1427_vm5, %v1416_v63 }
 0x3cd   :  { %1094 = vmatmul.mubr.msk.f32.vlgmr.msra.gmra.mrb[4].mxu1 %vm488_vm9, %v718_v16  ;;  %1168 = vmatpush1.bf16.msk.msra.mxu0 %vm1427_vm5, %v1443_v10 }
 0x3ce   :  { %1172 = vmatpush1.bf16.msra.mxu1 %v1331_v25  ;;  %962 = vmatprep.mubr.f32.mxu1 %v1241_v4 }
 0x3cf   :  { %1174 = vmatprep.subr.bf16.mxu1 %v1346_v30 }
 0x3d2   :  { %1176 = vmatpush1.bf16.msra.mxu1 %v1365_v36 }
 0x3d3   :  { %1178 = vmatprep.subr.bf16.mxu1 %v1391_v55  ;;  %v1249_v55 = vmov 13  }
 0x3d4   :  { %1208 = vset.pattern.permute.xlu0 %v1249_v55 }
 0x3d6   :  { %1180 = vmatpush1.bf16.msra.mxu1 %v1402_v59 }
 0x3d7   :  { %1183 = vmatprep.subr.msk.bf16.mxu1 %vm1427_vm5, %v1431_v7 }
 0x3da   :  { %1186 = vmatpush1.bf16.msk.msra.mxu1 %vm1427_vm5, %v1445_v11 }
 0x492   :  { %v561_v20 = vpop.f32.mrb[6].mxu0 }
 0x493   :  { %v1080_v21 = vpop.f32.mrb[7].mxu0 }
 0x4a0   :  { %v790_v25 = vpop.f32.mrb[4].mxu1 }
 0x4a1   :  { %v1187_v4 = vadd.f32 %v790_v25, %v561_v20  ;;  %v1095_v29 = vpop.f32.mrb[5].mxu1 }
 0x4a3   :  { %v796_v30 = vsel %vm795_vm10, %v1187_v4, 0.0  ;;  %v800_v34 = vmul.f32 %v1187_v4, %v1187_v4 }
 0x4a4   :  { %797 = vadd.xlane.f32.xlu1 %v796_v30 }
 0x4a5   :  { %v801_v36 = vsel %vm795_vm10, %v800_v34, 0.0 }
 0x4a6   :  { %802 = vadd.xlane.f32.xlu0 %v801_v36 }
 0x4bc   :  { %819 = vperm.xlu0 %1208, %v1523_v53  }
 0x4c0   :  { %1210 = vset.pattern.permute.xlu0 %v1250_v24 }
 0x531   :  { %v798_v56 = vpop.xlane.xlu1 %797 }
 0x532   :  { %v799_v59 = vmul.f32 0.016666668, %v798_v56 }
 0x533   :  { %v803_v63 = vpop.xlane.xlu0 %802 }
 0x534   :  { %v805_v5 = vmul.f32 %v799_v59, %v799_v59  ;;  %v804_v7 = vmul.f32 0.016666668, %v803_v63  ;;  %v808_v15 = vsub.f32 %v1187_v4, %v799_v59 }
 0x536   :  { %v806_v10 = vsub.f32 %v804_v7, %v805_v5 }
 0x538   :  { %v807_v11 = vmax.f32 %v806_v10, 0.0 }
 0x53a   :  { %v809_v12 = vadd.f32 1e-05, %v807_v11 }
 0x53b   :  { %v820_v18 = vpop.permute.xlu0 %819 }
 0x53c   :  { %1213 = vrsqrt.f32 %v809_v12 }
 0x546   :  { %v1214_v13 = vpop.eup %1213 }
 0x547   :  { %v811_v14 = vmul.f32 %v1214_v13, %v1523_v53 }
 0x549   :  { %814 = vperm.xlu1 %1207, %v811_v14  }
 0x54d   :  { %1209 = vset.pattern.permute.xlu1 %v1250_v24 }
 0x5c8   :  { %v815_v17 = vpop.permute.xlu1 %814 }
 0x5c9   :  { %v817_v19 = vmul.f32 %v815_v17, %v808_v15 }
 0x5cb   :  { %v822_v22 = vadd.f32 %v820_v18, %v817_v19 }
 0x5cd   :  { %v823_v23 = vmax.f32 %v822_v22, 0.0 }
 0x5cf   :  { %1051 = vmatmul.mubr.msk.f32.vlgmr.msra.gmra.mrb[8].mxu0 %vm177_vm6, %v823_v23  ;;  %1054 = vmatmul.mubr.msk.f32.vlgmr.msra.gmra.mrb[6].mxu1 %vm177_vm6, %v823_v23 }
 0x6a2   :  { %v893_v28 = vpop.f32.mrb[8].mxu0  ;;  %v964_v31 = vpop.f32.mrb[6].mxu1 }
 0x6a3   :  { %v895_v32 = vpop.f32.mrb[9].mxu0  ;;  %v966_v33 = vpop.f32.mrb[7].mxu1 }
 0x6a4   :  { %v969_v35 = vmax.f32 %v893_v28, %v895_v32  ;;  %v970_v37 = vmax.f32 %v964_v31, %v966_v33 }
 0x6a6   :  { %v971_v39 = vmax.f32 %v969_v35, %v970_v37 }
 0x6a8   :  { %v972_v40 = vmul.f32 %v971_v39, %v69_v38 }
 0x6aa   :  { %v996_v41 = vsel %vm995_vm13, %v972_v40, 0.0  ;;  %v978_v42 = vsel %vm976_vm14, %v972_v40, 0.0 }
 0x6ab   :  { %v997_v43 = vsel %vm979_vm15, %v996_v41, 0.0  ;;  %v980_v44 = vsel %vm979_vm15, %v978_v42, 0.0 }
 0x6ac   :  { %998 = vadd.xlane.f32.xlu0 %v997_v43  ;;  %981 = vadd.xlane.f32.xlu1 %v980_v44 }
 0x6bd   :  { %1012 = vperm.xlu1 %1209, %v70_v45  }
 0x739   :  { %v999_v46 = vpop.xlane.xlu0 %998  ;;  %v982_v47 = vpop.xlane.xlu1 %981 }
 0x73a   :  { %v1000_v48 = vsel %vm979_vm15, %v999_v46, 0.0  ;;  %v983_v49 = vsel %vm979_vm15, %v982_v47, 0.0 }
 0x73b   :  { %v1001_v50 = vrot.slane %v1000_v48, 4  ;;  %v984_v52 = vrot.slane %v983_v49, 4 }
 0x73d   :  { %v1002_v53 = vadd.f32 %v1001_v50, %v1000_v48  ;;  %v985_v54 = vadd.f32 %v984_v52, %v983_v49  ;;  %v1013_v9 = vpop.permute.xlu1 %1012 }
 0x73f   :  { %v1003_v57 = vrot.slane %v1002_v53, 2  ;;  %v986_v58 = vrot.slane %v985_v54, 2 }
 0x741   :  { %v1004_v60 = vadd.f32 %v1003_v57, %v1002_v53  ;;  %v987_v61 = vadd.f32 %v986_v58, %v985_v54 }
 0x743   :  { %v1005_v62 = vrot.slane %v1004_v60, 1  ;;  %v988_v0 = vrot.slane %v987_v61, 1 }
 0x745   :  { %v989_v1 = vadd.f32 %v988_v0, %v987_v61  ;;  %v1006_v2 = vadd.f32 %v1005_v62, %v1004_v60 }
 0x747   :  { %v991_v3 = vsel %vm990_vm0, %v989_v1, 0.0  ;;  %v1008_v8 = vsel %vm1007_vm1, %v1006_v2, 0.0 }
 0x748   :  { %v1009_v6 = vadd.f32 %v1008_v8, %v991_v3 }
 0x74a   :  { %v1015_v16 = vadd.f32 %v1013_v9, %v1009_v6 }
 0x74c   :  { %1017 = vst.msk [vmem:[#allocation2] sm:$0x1] %vm1016_vm2, %v1015_v16 }
 0x74d   :  { %1226 = shalt.err (!%p1223_p4)
}
 0x74e   :  { %s1227_s24 = scalar_lea.hbm %s1600_s3, 16 }
 0x74f   :  { %p1228_p5 = scmp.ne.s32.totalorder %s1600_s3, %s1227_s24  ;;  %p1231_p6 = scmp.lt.u32.totalorder %s1227_s24, %s1600_s3 }
 0x751   :  { %p1233_p7 = pnand %p1231_p6, %p1228_p5 }
 0x753   :  { %1236 = shalt.err (!%p1233_p7)
}
 0x754   :  { %1027 = dma.vmem_to_hbm [thread:$0]  %s1025_s0, 16, %s1600_s3, [#allocation3]  }
 0x755   :  { %1237 = dma.done.wait [#allocation3], 16  }
 0x756   :  { %1238 = vsyncadd [#allocation3], 4294967280 }
 0x757   :  { %1031 = vsyncpa [#allocation3], 1 }

</bundles_post_ra>
